<compile_context>
chip_gen: v7x
topology: tpu7x:2x2x1
jax: 0.10.0
libtpu: 0.0.40
codegen_flags: <defaults>
</compile_context>

<pallas_src>
import functools

import jax
import jax.numpy as jnp
from jax.experimental import pallas as pl
from jax.experimental.pallas import tpu as pltpu

_LANE = 128


def _reduce_chunks(x_ref, *, lane_p, valid_len):
    """Lane-shaped f32 (bt, C, lane_p) sum/max partials over one input tile.

    valid_len is the statically-known number of valid spatial positions in this
    tile. Only chunks containing >= 1 valid element are read; at most one chunk
    (the statically-known ragged one) is masked. Invalid lanes get 0 / -inf,
    which the final cross-lane sum/max ignore as long as valid_len >= 1 (true
    by construction since HW >= 1).
    """
    bt, c, _ = x_ref.shape
    n_live = -(-valid_len // lane_p)          # ceil: chunks with >=1 valid lane
    lane_ids = None
    tile_sum = tile_max = None
    for j in range(n_live):
        start = j * lane_p
        chunk = x_ref[:, :, pl.ds(start, lane_p)].astype(jnp.float32)
        rem = valid_len - start               # static
        if rem < lane_p:                      # the single ragged chunk
            if lane_ids is None:              # hoisted, shape-invariant iota
                lane_ids = jax.lax.broadcasted_iota(
                    jnp.int32, (bt, c, lane_p), 2)
            valid = lane_ids < rem
            chunk_s = jnp.where(valid, chunk, 0.0)
            chunk_m = jnp.where(valid, chunk, -jnp.inf)
        else:                                 # unmasked fast path
            chunk_s = chunk_m = chunk
        if tile_sum is None:                  # seed from the first chunk
            tile_sum, tile_max = chunk_s, chunk_m
        else:
            tile_sum = tile_sum + chunk_s
            tile_max = jnp.maximum(tile_max, chunk_m)
    return tile_sum, tile_max


def _mlp_sigmoid_store(avg, mx, w1_ref, w2_ref, o_ref):
    """Fused shared MLP (one pass through w1/w2 for both branches) + sigmoid."""
    bt = avg.shape[0]
    stacked = jnp.concatenate([avg, mx], axis=0)                  # (2*bt, C)
    # Weights stay in native dtype; the MXU accumulates in f32.
    h = jnp.maximum(
        jnp.dot(stacked, w1_ref[...], preferred_element_type=jnp.float32), 0.0)
    y = jnp.dot(h, w2_ref[...], preferred_element_type=jnp.float32)
    out = y[:bt] + y[bt:]
    o_ref[...] = jax.nn.sigmoid(out)[:, None, :].astype(o_ref.dtype)


def _ca_single_kernel(x_ref, w1_ref, w2_ref, o_ref, *, hw_total, lane_p):
    # Whole spatial extent fits in one block: no grid-carried state at all.
    ts, tm = _reduce_chunks(x_ref, lane_p=lane_p, valid_len=hw_total)
    avg = jnp.sum(ts, axis=-1) * (1.0 / float(hw_total))           # (bt, C)
    mx = jnp.max(tm, axis=-1)                                      # (bt, C)
    _mlp_sigmoid_store(avg, mx, w1_ref, w2_ref, o_ref)


def _ca_stream_kernel(x_ref, w1_ref, w2_ref, o_ref, sum_sc, max_sc, *,
                      hw_total, hw_tile, lane_p, num_hw_tiles, tail_len):
    # x_ref:  (bt, C, hw_tile) input tile (native dtype)
    # sum_sc/max_sc: (bt, C, lane_p) f32 lane-shaped running partials
    k = pl.program_id(1)
    last = num_hw_tiles - 1

    def accumulate(tile_sum, tile_max, may_be_first):
        if may_be_first:
            @pl.when(k == 0)
            def _seed():                      # seed scratch from the first tile
                sum_sc[...] = tile_sum
                max_sc[...] = tile_max

            @pl.when(k > 0)
            def _acc():
                sum_sc[...] = sum_sc[...] + tile_sum
                max_sc[...] = jnp.maximum(max_sc[...], tile_max)
        else:                                 # tail tile: k == last > 0 here
            sum_sc[...] = sum_sc[...] + tile_sum
            max_sc[...] = jnp.maximum(max_sc[...], tile_max)

    if tail_len == hw_tile:
        # HW divides hw_tile: every tile takes the unmasked fast path.
        ts, tm = _reduce_chunks(x_ref, lane_p=lane_p, valid_len=hw_tile)
        accumulate(ts, tm, may_be_first=True)
    else:
        @pl.when(k < last)
        def _full_tiles():                    # steady state: pure add/max
            ts, tm = _reduce_chunks(x_ref, lane_p=lane_p, valid_len=hw_tile)
            accumulate(ts, tm, may_be_first=True)

        @pl.when(k == last)
        def _tail_tile():                     # only the ragged tail is masked
            ts, tm = _reduce_chunks(x_ref, lane_p=lane_p, valid_len=tail_len)
            accumulate(ts, tm, may_be_first=False)

    @pl.when(k == last)
    def _finalize():
        avg = jnp.sum(sum_sc[...], axis=-1) * (1.0 / float(hw_total))
        mx = jnp.max(max_sc[...], axis=-1)
        _mlp_sigmoid_store(avg, mx, w1_ref, w2_ref, o_ref)


def _largest_divisor_leq(n, limit):
    limit = max(1, min(n, limit))
    for d in range(limit, 0, -1):
        if n % d == 0:
            return d
    return 1


def channel_attention(x, w1, w2, *, hw_tile_target=8192,
                      min_block_bytes=1 << 20):
    """x: (B, C, H, W). w1 = fc1.weight.T (C, C//r), w2 = fc2.weight.T (C//r, C).
    Returns sigmoid(MLP(avgpool(x)) + MLP(maxpool(x))) of shape (B, C, 1, 1)."""
    B, C, H, W = x.shape
    Cr = w1.shape[1]
    HW = H * W
    xr = x.reshape(B, C, HW)
    itemsize = x.dtype.itemsize

    # Generation-aware VMEM budget (64 MiB on v7x, 128 MiB on v5e/v6e).
    try:
        info = pltpu.get_tpu_info()
        vmem_cap = int(getattr(info, "vmem_capacity_bytes", 64 << 20))
    except Exception:
        vmem_cap = 64 << 20                   # conservative fallback (v7x)
    usable_vmem = (vmem_cap * 7) // 10        # headroom for compiler scratch

    # Lane-aligned spatial tile: as large as possible (amortize the ~0.35 us
    # per-grid-step overhead), capped by hw_tile_target and the VMEM budget.
    if HW <= _LANE:
        hw_tile, lane_p = HW, HW
    else:
        hw_tile = min(hw_tile_target, pl.cdiv(HW, _LANE) * _LANE)
        lane_p = _LANE

    w_bytes = 2 * (C * Cr + Cr * C) * w1.dtype.itemsize

    def vmem_need(bt_, tile_):
        return (2 * bt_ * C * tile_ * itemsize          # double-buffered x tile
                + w_bytes                               # weights
                + 2 * bt_ * C * min(tile_, _LANE) * 4   # sum/max scratch
                + 2 * bt_ * C * itemsize)               # output block

    while hw_tile > _LANE and vmem_need(1, hw_tile) > usable_vmem:
        hw_tile = max(_LANE, (hw_tile // 2 + _LANE - 1) // _LANE * _LANE)

    # Fold batch rows into the block when one row's tile is still small (e.g.
    # C < 128), so each grid step moves >= ~min_block_bytes of input.
    per_row = C * hw_tile * itemsize
    want_bt = min(B, max(1, -(-min_block_bytes // per_row)))
    while want_bt > 1 and vmem_need(want_bt, hw_tile) > usable_vmem:
        want_bt -= 1
    bt = _largest_divisor_leq(B, want_bt)

    n_hw_tiles = pl.cdiv(HW, hw_tile)
    tail_len = HW - (n_hw_tiles - 1) * hw_tile
    n_b_tiles = B // bt

    need = vmem_need(bt, hw_tile)
    vmem_limit = int(min((vmem_cap * 3) // 4, max(need + need // 2, 32 << 20)))

    cost = pl.CostEstimate(
        flops=int(2 * B * C * HW + 8 * B * C * Cr),
        transcendentals=int(B * C),
        bytes_accessed=int(xr.size * itemsize
                           + (w1.size + w2.size) * w1.dtype.itemsize
                           + B * C * itemsize),
    )

    out_shape = jax.ShapeDtypeStruct((B, 1, C), x.dtype)

    if n_hw_tiles == 1:
        # Single-pass: skip the init/accumulate/finalize machinery entirely.
        kernel = functools.partial(_ca_single_kernel, hw_total=HW, lane_p=lane_p)
        grid = (n_b_tiles,)
        in_specs = [
            pl.BlockSpec((bt, C, hw_tile), lambda b: (b, 0, 0)),
            pl.BlockSpec((C, Cr), lambda b: (0, 0)),
            pl.BlockSpec((Cr, C), lambda b: (0, 0)),
        ]
        out_specs = pl.BlockSpec((bt, 1, C), lambda b: (b, 0, 0))
        scratch_shapes = []
        dim_sem = ("parallel",)
    else:
        kernel = functools.partial(
            _ca_stream_kernel, hw_total=HW, hw_tile=hw_tile, lane_p=lane_p,
            num_hw_tiles=n_hw_tiles, tail_len=tail_len)
        grid = (n_b_tiles, n_hw_tiles)
        in_specs = [
            pl.BlockSpec((bt, C, hw_tile), lambda b, k: (b, 0, k)),
            pl.BlockSpec((C, Cr), lambda b, k: (0, 0)),
            pl.BlockSpec((Cr, C), lambda b, k: (0, 0)),
        ]
        out_specs = pl.BlockSpec((bt, 1, C), lambda b, k: (b, 0, 0))
        scratch_shapes = [pltpu.VMEM((bt, C, lane_p), jnp.float32),
                          pltpu.VMEM((bt, C, lane_p), jnp.float32)]
        dim_sem = ("parallel", "arbitrary")

    out = pl.pallas_call(
        kernel,
        out_shape=out_shape,
        grid_spec=pltpu.PrefetchScalarGridSpec(
            num_scalar_prefetch=0,
            grid=grid,
            in_specs=in_specs,
            out_specs=out_specs,
            scratch_shapes=scratch_shapes,
        ),
        compiler_params=pltpu.CompilerParams(
            dimension_semantics=dim_sem,
            vmem_limit_bytes=vmem_limit,
        ),
        cost_estimate=cost,
    )(xr, w1, w2)

    return out.reshape(B, C, 1, 1)


if __name__ == "__main__":
    # Small shapes consistent with the module:
    #   num_channels=32, reduction_ratio=4 -> hidden = 8
    B, C, H, W = 2, 32, 16, 16
    reduction_ratio = 4
    Cr = C // reduction_ratio

    key = jax.random.PRNGKey(0)
    kx, k1, k2 = jax.random.split(key, 3)

    x = jax.random.normal(kx, (B, C, H, W), dtype=jnp.float32)
    # PyTorch Linear(in, out) weight is (out, in) and applies x @ W.T; we store
    # the transposed forms directly.
    w1 = jax.random.normal(k1, (C, Cr), dtype=jnp.float32) * (1.0 / jnp.sqrt(C))
    w2 = jax.random.normal(k2, (Cr, C), dtype=jnp.float32) * (1.0 / jnp.sqrt(Cr))

    out = channel_attention(x, w1, w2)
    out = jax.block_until_ready(out)

    # Pure-JAX reference for correctness.
    avg = jnp.mean(x, axis=(2, 3))
    mx = jnp.max(x, axis=(2, 3))
    mlp = lambda v: jnp.maximum(v @ w1, 0.0) @ w2
    ref = jax.nn.sigmoid(mlp(avg) + mlp(mx)).reshape(B, C, 1, 1)

    assert out.shape == (B, C, 1, 1)
    assert jnp.allclose(out, ref, atol=1e-5, rtol=1e-5)
    print("KERNEL_OK")
</pallas_src>

<mosaic_0001>
module attributes {stable_mosaic.version = 11 : i64} {
  func.func @_ca_single_kernel(%arg0: i32, %arg1: memref<2x32x256xf32, #tpu.memory_space<vmem>>, %arg2: memref<32x8xf32, #tpu.memory_space<vmem>>, %arg3: memref<8x32xf32, #tpu.memory_space<vmem>>, %arg4: memref<2x1x32xf32, #tpu.memory_space<vmem>>) attributes {dimension_semantics = [#tpu.dimension_semantics<parallel>], iteration_bounds = array<i64: 1>, scalar_prefetch = 0 : i64, scratch_operands = 0 : i64, tpu.core_type = #tpu.core_type<tc>, window_params = [{transform_indices = @transform_0, window_bounds = array<i64: 2, 32, 256>}, {pipeline_mode = #tpu.pipeline_mode<synchronous>, transform_indices = @transform_1, window_bounds = array<i64: 32, 8>}, {pipeline_mode = #tpu.pipeline_mode<synchronous>, transform_indices = @transform_2, window_bounds = array<i64: 8, 32>}, {transform_indices = @transform_3, window_bounds = array<i64: 2, 1, 32>}]} {
    %c0 = arith.constant 0 : index
    %c0_0 = arith.constant 0 : index
    %c0_1 = arith.constant 0 : index
    %0 = vector.load %arg1[%c0, %c0_0, %c0_1] : memref<2x32x256xf32, #tpu.memory_space<vmem>>, vector<2x32x128xf32>
    %c0_2 = arith.constant 0 : index
    %c0_3 = arith.constant 0 : index
    %c128 = arith.constant 128 : index
    %1 = vector.load %arg1[%c0_2, %c0_3, %c128] : memref<2x32x256xf32, #tpu.memory_space<vmem>>, vector<2x32x128xf32>
    %2 = arith.addf %0, %1 : vector<2x32x128xf32>
    %3 = arith.maximumf %0, %1 : vector<2x32x128xf32>
    %cst = arith.constant dense<0.000000e+00> : vector<2x32xf32>
    %4 = vector.multi_reduction <add>, %2, %cst [2] : vector<2x32x128xf32> to vector<2x32xf32>
    %cst_4 = arith.constant 3.906250e-03 : f32
    %5 = vector.broadcast %cst_4 : f32 to vector<2x32xf32>
    %6 = arith.mulf %4, %5 : vector<2x32xf32>
    %cst_5 = arith.constant dense<0xFF800000> : vector<2x32xf32>
    %7 = vector.multi_reduction <maximumf>, %3, %cst_5 [2] : vector<2x32x128xf32> to vector<2x32xf32>
    %8 = tpu.concatenate %6, %7 in 0 : vector<2x32xf32>, vector<2x32xf32> -> vector<4x32xf32>
    %c0_6 = arith.constant 0 : index
    %c0_7 = arith.constant 0 : index
    %9 = vector.load %arg2[%c0_6, %c0_7] : memref<32x8xf32, #tpu.memory_space<vmem>>, vector<32x8xf32>
    %cst_8 = arith.constant dense<0.000000e+00> : vector<4x8xf32>
    %10 = tpu.matmul %8, %9, %cst_8 {dimension_numbers = #tpu.dot_dimension_numbers<[1], [0], [0], [1], [0, 0, 1, 1], [], []>} : vector<4x32xf32>, vector<32x8xf32>, vector<4x8xf32> -> vector<4x8xf32>
    %cst_9 = arith.constant 0.000000e+00 : f32
    %11 = vector.broadcast %cst_9 : f32 to vector<4x8xf32>
    %12 = arith.maximumf %10, %11 : vector<4x8xf32>
    %c0_10 = arith.constant 0 : index
    %c0_11 = arith.constant 0 : index
    %13 = vector.load %arg3[%c0_10, %c0_11] : memref<8x32xf32, #tpu.memory_space<vmem>>, vector<8x32xf32>
    %cst_12 = arith.constant dense<0.000000e+00> : vector<4x32xf32>
    %14 = tpu.matmul %12, %13, %cst_12 {dimension_numbers = #tpu.dot_dimension_numbers<[1], [0], [0], [1], [0, 0, 1, 1], [], []>} : vector<4x8xf32>, vector<8x32xf32>, vector<4x32xf32> -> vector<4x32xf32>
    %15 = vector.extract_strided_slice %14 {offsets = [0, 0], sizes = [2, 32], strides = [1, 1]} : vector<4x32xf32> to vector<2x32xf32>
    %16 = vector.extract_strided_slice %14 {offsets = [2, 0], sizes = [2, 32], strides = [1, 1]} : vector<4x32xf32> to vector<2x32xf32>
    %17 = arith.addf %15, %16 : vector<2x32xf32>
    %18 = arith.negf %17 : vector<2x32xf32>
    %19 = math.exp %18 : vector<2x32xf32>
    %cst_13 = arith.constant 1.000000e+00 : f32
    %20 = vector.broadcast %cst_13 : f32 to vector<2x32xf32>
    %21 = arith.addf %20, %19 : vector<2x32xf32>
    %22 = arith.divf %20, %21 : vector<2x32xf32>
    %23 = vector.shape_cast %22 : vector<2x32xf32> to vector<2x1x32xf32>
    %c0_14 = arith.constant 0 : index
    %c0_15 = arith.constant 0 : index
    %c0_16 = arith.constant 0 : index
    %24 = vector.load %arg4[%c0_14, %c0_15, %c0_16] : memref<2x1x32xf32, #tpu.memory_space<vmem>>, vector<2x1x32xf32>
    tpu.vector_store %arg4[%c0_14, %c0_15, %c0_16], %23 {strides = array<i32>} : memref<2x1x32xf32, #tpu.memory_space<vmem>>, vector<2x1x32xf32>,
    return
  }
  func.func @transform_0(%arg0: i32) -> (i32, i32, i32) {
    %c0_i32 = arith.constant 0 : i32
    %c0_i32_0 = arith.constant 0 : i32
    %c0_i32_1 = arith.constant 0 : i32
    return %arg0, %c0_i32, %c0_i32_0 : i32, i32, i32
  }
  func.func @transform_1(%arg0: i32) -> (i32, i32) {
    %c0_i32 = arith.constant 0 : i32
    %c0_i32_0 = arith.constant 0 : i32
    %c0_i32_1 = arith.constant 0 : i32
    return %c0_i32, %c0_i32_0 : i32, i32
  }
  func.func @transform_2(%arg0: i32) -> (i32, i32) {
    %c0_i32 = arith.constant 0 : i32
    %c0_i32_0 = arith.constant 0 : i32
    %c0_i32_1 = arith.constant 0 : i32
    return %c0_i32, %c0_i32_0 : i32, i32
  }
  func.func @transform_3(%arg0: i32) -> (i32, i32, i32) {
    %c0_i32 = arith.constant 0 : i32
    %c0_i32_0 = arith.constant 0 : i32
    %c0_i32_1 = arith.constant 0 : i32
    return %arg0, %c0_i32, %c0_i32_0 : i32, i32, i32
  }
}

</mosaic_0001>

<bundles_post_ra>
// kernel: tpu_custom_call.1
= control target key start
LH: loop header
LB: loop body
LE: loop exit
PB: predicated region body
PF: predicated region fallthrough
CT: control target
= control target key end

     0   :  { %8 = vsyncpa [#allocation3], 0  ;;  %s603_s0 = inlined_call_operand.hbm [shape: f32[2,32,256], index: 0, kind: input, shape index: {}]   ;;  %s604_s1 = inlined_call_operand.vmem [shape: f32[32,8], index: 1, kind: input, shape index: {}]   ;;  %s605_s2 = inlined_call_operand.vmem [shape: f32[8,32], index: 2, kind: input, shape index: {}]   ;;  %s606_s3 = inlined_call_operand.hbm [shape: f32[2,1,32], index: 3, kind: output, shape index: {}]  }
   0x1   :  { %9 = vsyncpa [#allocation4], 0  ;;  %s511_s12 = smov [#allocation2]   ;;  %s463_s16 = scalar_lea.hbm %s603_s0, 2048 }
   0x2   :  { %s15_s13 = sshll.u32 %s511_s12, 4  ;;  %p464_p0 = scmp.ne.s32.totalorder %s603_s0, %s463_s16  ;;  %s16_s13 = int_to_ptr.vmem [resolvable:$true] %s15_s13 }
   0x3   :  { %p467_p1 = scmp.lt.u32.totalorder %s463_s16, %s603_s0 }
   0x5   :  { %p469_p2 = pnand %p467_p1, %p464_p0 }
   0x7   :  { %472 = shalt.err (!%p469_p2)
}
   0x8   :  { %s473_s21 = scalar_lea.vmem %s16_s13, 2048  ;;  %p478_p4 = scmp.lt.s32.totalorder %s16_s13, %s16_s13 }
   0x9   :  { %p474_p3 = scmp.ne.s32.totalorder %s16_s13, %s473_s21  ;;  %p479_p5 = scmp.lt.s32.totalorder %s473_s21, %s473_s21 }
   0xb   :  { %p480_p6 = por %p479_p5, %p478_p4 }
   0xd   :  { %p481_p7 = pnand %p480_p6, %p474_p3 }
   0xf   :  { %484 = shalt.err (!%p481_p7)
}
  0x10   :  { %s512_s22 = smov 256   ;;  %s513_s23 = smov 16  }
  0x11   :  { %21 = dma.hbm_to_vmem [thread:$0]  %s603_s0, 2048, %s16_s13, [#allocation3], %s512_s22, %s512_s22, %s513_s23  }
  0x12   :  { %507 = dma.done.wait [#allocation3], 2048  }
  0x13   :  { %508 = vsyncadd [#allocation3], 4294965248  ;;  %v33_v0 = vld [vmem:[#allocation2 + $0x40] sm:$0xff]  ;;  %v41_v1 = vld [vmem:[#allocation2 + $0x48] sm:$0xff]  ;;  %v514_v35 = vmov 0.0|0.0   ;;  %vm515_vm0 = vmmov 0   ;;  %v109_v45 = vlaneseq }
  0x14   :  { %v29_v2 = vld [vmem:[#allocation2] sm:$0xff]  ;;  %v49_v3 = vadd.f32 %v41_v1, %v33_v0  ;;  %v37_v4 = vld [vmem:[#allocation2 + $0x8] sm:$0xff]  ;;  %v34_v5 = vld [vmem:[#allocation2 + $0x50] sm:$0xff]  ;;  %v57_v27 = vmax.f32 %v33_v0, %v41_v1  ;;  %444 = vmatprep.subr.bf16.mxu0 %v514_v35  ;;  %v516_v39 = vmov 0.0   ;;  %vm120_vm1 = vcmask 130112  }
  0x15   :  { %v42_v6 = vld [vmem:[#allocation2 + $0x58] sm:$0xff]  ;;  %v45_v7 = vadd.f32 %v37_v4, %v29_v2  ;;  %v30_v8 = vld [vmem:[#allocation2 + $0x10] sm:$0xff]  ;;  %v35_v12 = vld [vmem:[#allocation2 + $0x60] sm:$0xff]  ;;  %v53_v25 = vmax.f32 %v29_v2, %v37_v4  ;;  %436 = vmatprep.mubr.msk.f32.mxu0 %vm515_vm0, %v516_v39  ;;  %439 = vmatprep.subr.mxu1 %v516_v39  ;;  %v110_v48 = vand.u32 127, %v109_v45  ;;  %v565_v50 = vshrl.u32 %v109_v45, 7 }
  0x16   :  { %v38_v9 = vld [vmem:[#allocation2 + $0x18] sm:$0xff]  ;;  %69 = vadd.xlane.f32.xlu1 %v49_v3  ;;  %v50_v10 = vadd.f32 %v42_v6, %v34_v5  ;;  %v43_v13 = vld [vmem:[#allocation2 + $0x68] sm:$0xff]  ;;  %v31_v14 = vld [vmem:[#allocation2 + $0x20] sm:$0xff]  ;;  %v58_v26 = vmax.f32 %v34_v5, %v42_v6  ;;  %441 = vmatprep.mubr.msk.f32.mxu1 %vm515_vm0, %v516_v39  ;;  %vm127_vm2 = vcmask 195712   ;;  %vm134_vm3 = vcmask 261312  }
  0x17   :  { %61 = vadd.xlane.f32.xlu0 %v45_v7  ;;  %v46_v11 = vadd.f32 %v38_v9, %v30_v8  ;;  %v39_v15 = vld [vmem:[#allocation2 + $0x28] sm:$0xff]  ;;  %v51_v16 = vadd.f32 %v43_v13, %v35_v12  ;;  %v36_v18 = vld [vmem:[#allocation2 + $0x70] sm:$0xff]  ;;  %v44_v19 = vld [vmem:[#allocation2 + $0x78] sm:$0xff]  ;;  %v54_v24 = vmax.f32 %v30_v8, %v38_v9  ;;  %v59_v28 = vmax.f32 %v35_v12, %v43_v13 }
  0x18   :  { %v47_v17 = vadd.f32 %v39_v15, %v31_v14  ;;  %v32_v20 = vld [vmem:[#allocation2 + $0x30] sm:$0xff]  ;;  %v40_v21 = vld [vmem:[#allocation2 + $0x38] sm:$0xff]  ;;  %v52_v22 = vadd.f32 %v44_v19, %v36_v18  ;;  %v55_v29 = vmax.f32 %v31_v14, %v39_v15  ;;  %v60_v30 = vmax.f32 %v36_v18, %v44_v19  ;;  %v209_v32 = vld [vmem:[%s604_s1] sm:$0xff] }
  0x19   :  { %v48_v23 = vadd.f32 %v40_v21, %v32_v20  ;;  %v56_v31 = vmax.f32 %v32_v20, %v40_v21  ;;  %v210_v33 = vld [vmem:[%s604_s1 + $0x8] sm:$0xff]  ;;  %v211_v36 = vld [vmem:[%s604_s1 + $0x10] sm:$0xff]  ;;  %v212_v37 = vld [vmem:[%s604_s1 + $0x18] sm:$0xff]  ;;  %v115_v51 = vadd.s32 4294967288, %v110_v48  ;;  %v122_v52 = vadd.s32 4294967280, %v110_v48 }
  0x1a   :  { %71 = vadd.xlane.f32.xlu1 %v50_v10  ;;  %v445_v34 = vpack.c.bf16 %v210_v33, %v209_v32  ;;  %v448_v38 = vpack.c.bf16 %v212_v37, %v211_v36  ;;  %v129_v54 = vadd.s32 4294967272, %v110_v48  ;;  %v113_v56 = vsub.s32 %v110_v48, %v565_v50 }
  0x1b   :  { %63 = vadd.xlane.f32.xlu0 %v46_v11  ;;  %v118_v57 = vsub.s32 %v115_v51, %v565_v50  ;;  %v125_v59 = vsub.s32 %v122_v52, %v565_v50  ;;  %vm155_vm4 = vcmask 1041409   ;;  %vm204_vm5 = vcmask 1043459  }
  0x1c   :  { %446 = vmatpush3.bf16.msra.mxu0 %v445_v34  ;;  %v132_v2 = vsub.s32 %v129_v54, %v565_v50  ;;  %vm207_vm6 = vcmask 1041408   ;;  %vm213_vm7 = vcmask 261120   ;;  %vm289_vm8 = vcmask 64512  }
  0x1d   :  { %447 = vmatprep.subr.bf16.mxu0 %v514_v35  ;;  %vm398_vm9 = vcmask 253952  }
  0x1e   :  { %73 = vadd.xlane.f32.xlu1 %v51_v16 }
  0x1f   :  { %65 = vadd.xlane.f32.xlu0 %v47_v17 }
  0x20   :  { %449 = vmatpush3.bf16.msra.mxu0 %v448_v38 }
  0x22   :  { %75 = vadd.xlane.f32.xlu1 %v52_v22 }
  0x23   :  { %67 = vadd.xlane.f32.xlu0 %v48_v23 }
  0x26   :  { %87 = vmax.xlane.f32.xlu1 %v54_v24 }
  0x27   :  { %85 = vmax.xlane.f32.xlu0 %v53_v25 }
  0x2a   :  { %95 = vmax.xlane.f32.xlu1 %v58_v26 }
  0x2b   :  { %93 = vmax.xlane.f32.xlu0 %v57_v27 }
  0x2e   :  { %97 = vmax.xlane.f32.xlu1 %v59_v28 }
  0x2f   :  { %89 = vmax.xlane.f32.xlu0 %v55_v29 }
  0x32   :  { %99 = vmax.xlane.f32.xlu1 %v60_v30 }
  0x33   :  { %91 = vmax.xlane.f32.xlu0 %v56_v31 }
  0xa3   :  { %v70_v40 = vpop.xlane.xlu1 %69 }
  0xa4   :  { %v62_v41 = vpop.xlane.xlu0 %61  ;;  %v81_v60 = vmul.f32 0.00390625, %v70_v40 }
  0xa5   :  { %v77_v61 = vmul.f32 0.00390625, %v62_v41  ;;  %v288_v41 = vld [vmem:[%s605_s2] sm:$0xff]  ;;  %s518_s2 = smov [#allocation5]  }
  0xa6   :  { %v139_v7 = vrot.slane %v81_v60, %v113_v56  ;;  %440 = vmatpush3.msra.mxu1 %v288_v41  ;;  %s406_s7 = sshll.u32 %s518_s2, 4  ;;  %s407_s7 = int_to_ptr.vmem [resolvable:$true] %s406_s7 }
  0xa7   :  { %v72_v42 = vpop.xlane.xlu1 %71  ;;  %v114_v8 = vrot.slane %v77_v61, %v113_v56  ;;  %s485_s8 = scalar_lea.vmem %s407_s7, 32  ;;  %p490_p9 = scmp.lt.s32.totalorder %s407_s7, %s407_s7 }
  0xa8   :  { %v64_v43 = vpop.xlane.xlu0 %63  ;;  %v82_v58 = vmul.f32 0.00390625, %v72_v42  ;;  %p486_p8 = scmp.ne.s32.totalorder %s407_s7, %s485_s8  ;;  %p491_p10 = scmp.lt.s32.totalorder %s485_s8, %s485_s8 }
  0xa9   :  { %v78_v62 = vmul.f32 0.00390625, %v64_v43 }
  0xaa   :  { %v143_v6 = vrot.slane %v82_v58, %v118_v57  ;;  %p492_p11 = por %p491_p10, %p490_p9 }
  0xab   :  { %v74_v44 = vpop.xlane.xlu1 %73  ;;  %v119_v9 = vrot.slane %v78_v62, %v118_v57 }
  0xac   :  { %v66_v46 = vpop.xlane.xlu0 %65  ;;  %v83_v63 = vmul.f32 0.00390625, %v74_v44  ;;  %v144_v21 = vsel %vm120_vm1, %v143_v6, %v139_v7  ;;  %p493_p12 = pnand %p492_p11, %p486_p8 }
  0xad   :  { %v79_v1 = vmul.f32 0.00390625, %v66_v46  ;;  %v121_v23 = vsel %vm120_vm1, %v119_v9, %v114_v8 }
  0xae   :  { %v148_v10 = vrot.slane %v83_v63, %v125_v59 }
  0xaf   :  { %v76_v47 = vpop.xlane.xlu1 %75  ;;  %v126_v12 = vrot.slane %v79_v1, %v125_v59 }
  0xb0   :  { %v68_v49 = vpop.xlane.xlu0 %67  ;;  %v84_v3 = vmul.f32 0.00390625, %v76_v47  ;;  %v149_v24 = vsel %vm127_vm2, %v148_v10, %v144_v21 }
  0xb1   :  { %v80_v5 = vmul.f32 0.00390625, %v68_v49  ;;  %v128_v26 = vsel %vm127_vm2, %v126_v12, %v121_v23 }
  0xb2   :  { %v153_v13 = vrot.slane %v84_v3, %v132_v2 }
  0xb3   :  { %v88_v53 = vpop.xlane.xlu1 %87  ;;  %v133_v17 = vrot.slane %v80_v5, %v132_v2 }
  0xb4   :  { %v86_v55 = vpop.xlane.xlu0 %85  ;;  %v173_v18 = vrot.slane %v88_v53, %v118_v57  ;;  %v154_v27 = vsel %vm134_vm3, %v153_v13, %v149_v24  ;;  %v517_v53 = vmov 1966171168  }
  0xb5   :  { %v169_v19 = vrot.slane %v86_v55, %v113_v56  ;;  %v135_v31 = vsel %vm134_vm3, %v133_v17, %v128_v26  ;;  %v375_v54 = vunpack.c.l.s4 %v517_v53 }
  0xb6   :  { %v156_v38 = vsel %vm155_vm4, %v154_v27, %v135_v31 }
  0xb7   :  { %v96_v0 = vpop.xlane.xlu1 %95  ;;  %v174_v32 = vsel %vm120_vm1, %v173_v18, %v169_v19  ;;  %v376_v55 = vunpack.c.0.s8 %v375_v54 }
  0xb8   :  { %v94_v4 = vpop.xlane.xlu0 %93  ;;  %v192_v14 = vrot.slane %v96_v0, %v118_v57 }
  0xb9   :  { %v188_v15 = vrot.slane %v94_v4, %v113_v56  ;;  %v379_v56 = vsub.s32 %v376_v55, %v565_v50 }
  0xbb   :  { %v98_v11 = vpop.xlane.xlu1 %97  ;;  %v193_v28 = vsel %vm120_vm1, %v192_v14, %v188_v15 }
  0xbc   :  { %v90_v16 = vpop.xlane.xlu0 %89  ;;  %v197_v20 = vrot.slane %v98_v11, %v125_v59 }
  0xbd   :  { %v178_v22 = vrot.slane %v90_v16, %v125_v59 }
  0xbe   :  { %v198_v33 = vsel %vm127_vm2, %v197_v20, %v193_v28 }
  0xbf   :  { %v100_v25 = vpop.xlane.xlu1 %99  ;;  %v179_v35 = vsel %vm127_vm2, %v178_v22, %v174_v32 }
  0xc0   :  { %v202_v29 = vrot.slane %v100_v25, %v132_v2  ;;  %v92_v30 = vpop.xlane.xlu0 %91 }
  0xc1   :  { %v183_v34 = vrot.slane %v92_v30, %v132_v2 }
  0xc2   :  { %v203_v36 = vsel %vm134_vm3, %v202_v29, %v198_v33 }
  0xc3   :  { %v184_v37 = vsel %vm134_vm3, %v183_v34, %v179_v35 }
  0xc4   :  { %v205_v39 = vsel %vm204_vm5, %v203_v36, %v184_v37 }
  0xc5   :  { %v208_v40 = vsel %vm207_vm6, %v156_v38, %v205_v39 }
  0xc6   :  { %437 = vmatmul.mubr.msk.f32.vlgmr.msra.gmra.mrb[0].mxu0 %vm213_vm7, %v208_v40 }
 0x199   :  { %v283_v42 = vpop.f32.mrb[0].mxu0 }
 0x19a   :  { %v287_v43 = vmax.f32 %v283_v42, 0.0  ;;  %v438_v44 = vpop.f32.mrb[1].mxu0 }
 0x19c   :  { %442 = vmatmul.mubr.msk.f32.vlgmr.msra.gmra.mrb[0].mxu1 %vm289_vm8, %v287_v43 }
 0x26f   :  { %v359_v45 = vpop.f32.mrb[0].mxu1 }
 0x270   :  { %v364_v46 = vrot.slane %v359_v45, 2  ;;  %v443_v47 = vpop.f32.mrb[1].mxu1 }
 0x272   :  { %v366_v48 = vadd.f32 %v364_v46, %v359_v45 }
 0x274   :  { %v420_v49 = vmul.f32 -1.442695, %v366_v48 }
 0x276   :  { %459 = vpow2.f32 %v420_v49 }
 0x280   :  { %v460_v51 = vpop.eup %459 }
 0x281   :  { %v370_v52 = vadd.f32 1.0, %v460_v51 }
 0x283   :  { %461 = vrcp.f32 %v370_v52 }
 0x28d   :  { %v462_v57 = vpop.eup %461 }
 0x28e   :  { %v380_v58 = vrot.slane %v462_v57, %v379_v56 }
 0x290   :  { %v381_v59 = vcombine.high %v380_v58, %v380_v58  ;;  %v388_v60 = vrot.slane %v380_v58, %v379_v56 }
 0x292   :  { %v395_v61 = vrot.slane %v381_v59, %v379_v56  ;;  %399 = vst.msk [vmem:[#allocation5] sm:$0x1] %vm398_vm9, %v388_v60 }
 0x294   :  { %400 = vst.msk [vmem:[#allocation5 + $0x1] sm:$0x1] %vm398_vm9, %v395_v61 }
 0x295   :  { %496 = shalt.err (!%p493_p12)
}
 0x296   :  { %s497_s11 = scalar_lea.hbm %s606_s3, 32 }
 0x297   :  { %p498_p13 = scmp.ne.s32.totalorder %s606_s3, %s497_s11  ;;  %p501_p0 = scmp.lt.u32.totalorder %s497_s11, %s606_s3 }
 0x299   :  { %p503_p1 = pnand %p501_p0, %p498_p13 }
 0x29b   :  { %506 = shalt.err (!%p503_p1)
}
 0x29c   :  { %s519_s16 = smov 1  }
 0x29d   :  { %412 = dma.vmem_to_hbm [thread:$0]  %s407_s7, 32, %s606_s3, [#allocation4], %s513_s23, %s513_s23, %s519_s16  }
 0x29e   :  { %509 = dma.done.wait [#allocation4], 32  }
 0x29f   :  { %510 = vsyncadd [#allocation4], 4294967264 }
 0x2a0   :  { %416 = vsyncpa [#allocation3], 1 }
 0x2a1   :  { %417 = vsyncpa [#allocation4], 1 }

</bundles_post_ra>
